<compile_context>
chip_gen: v5e
topology: v5e:2x2
jax: 0.10.0
libtpu: 0.0.40
codegen_flags: <defaults>
</compile_context>

<pallas_src>
import functools

import jax
import jax.numpy as jnp
from jax.experimental import pallas as pl
from jax.experimental.pallas import tpu as pltpu


_MM_DTYPE = jnp.bfloat16
_VMEM_LIMIT = 32 * 1024 * 1024          # safe on v5e/v6e/v7x, above v5e default


def _pick_row_tile(n, max_tile=512):
    """Largest row tile that divides n and still yields >= 2 grid steps."""
    for t in (max_tile, 256, 128, 64, 32, 16, 8):
        if t <= n and n % t == 0 and n // t >= 2:
            return t
    return n


# ----------------------------- Pallas kernels ------------------------------ #

def _layernorm_kernel(x_ref, g_ref, b_ref, o_ref, *, eps):
    """LayerNorm over the last dim of a (TN, H) row block (no residual)."""
    x = x_ref[...].astype(jnp.float32)                     # (TN, H)
    mu = jnp.mean(x, axis=-1, keepdims=True)
    xc = x - mu
    var = jnp.mean(xc * xc, axis=-1, keepdims=True)
    y = xc * jax.lax.rsqrt(var + eps) * g_ref[...] + b_ref[...]
    o_ref[...] = y.astype(o_ref.dtype)


def _attn_block_kernel(x_ref, mask_ref, qkv_w_ref, qkv_b_ref,
                       ao_w_ref, ao_b_ref, g_ref, b_ref, o_ref, ctx_ref,
                       *, num_heads, head_dim, eps):
    """Fused QKV proj + MHA + output proj + residual + LayerNorm (one batch)."""
    x = x_ref[0]                                           # (S, H) bf16
    S, H = x.shape

    # Fused QKV projection (1/sqrt(d) already folded into the Q slice).
    qkv = jnp.dot(x, qkv_w_ref[...], preferred_element_type=jnp.float32)
    qkv = qkv + qkv_b_ref[...]                             # (S, 3H) f32

    # Attention-mask bias kept as a single (1, S) row, computed on the VPU.
    bias = (1.0 - mask_ref[0].astype(jnp.float32)) * -10000.0

    # Per-head attention; context written straight into a (S, H) f32 VMEM
    # scratch accumulator (no concatenate, no long live ranges).
    # TODO(synk): at real BERT dims group heads into 128-lane slabs (2 heads for
    #             d=64) to avoid sub-128-lane slicing of qkv.
    for h in range(num_heads):                             # static unroll
        lo = h * head_dim
        qh = qkv[:, lo:lo + head_dim].astype(_MM_DTYPE)            # (S, d) bf16
        kh = qkv[:, H + lo:H + lo + head_dim].astype(_MM_DTYPE)    # (S, d) bf16
        vh = qkv[:, 2 * H + lo:2 * H + lo + head_dim].astype(_MM_DTYPE)
        s = jax.lax.dot_general(qh, kh, (((1,), (1,)), ((), ())),
                                preferred_element_type=jnp.float32)  # (S, S) f32
        s = s + bias
        s = s - jnp.max(s, axis=-1, keepdims=True)
        p = jnp.exp(s)
        inv = pl.reciprocal(jnp.sum(p, axis=-1, keepdims=True), approx=True)
        p = (p * inv).astype(_MM_DTYPE)                    # bf16 for the MXU
        # TODO(synk): attention-dropout skipped (eval-mode equivalence only).
        ctx_ref[:, lo:lo + head_dim] = jnp.dot(
            p, vh, preferred_element_type=jnp.float32)

    attn = jnp.dot(ctx_ref[...].astype(ao_w_ref.dtype), ao_w_ref[...],
                   preferred_element_type=jnp.float32) + ao_b_ref[...]

    # Residual + LayerNorm in f32.
    y = attn + x.astype(jnp.float32)
    mu = jnp.mean(y, axis=-1, keepdims=True)
    yc = y - mu
    var = jnp.mean(yc * yc, axis=-1, keepdims=True)
    out = yc * jax.lax.rsqrt(var + eps) * g_ref[...] + b_ref[...]
    o_ref[0] = out.astype(o_ref.dtype)


def _ffn_block_kernel(x_ref, i_w_ref, i_b_ref, o_w_ref, o_b_ref,
                      g_ref, b_ref, o_ref, *, eps):
    """Fused intermediate-GELU + output proj + residual + LayerNorm (row tile)."""
    x = x_ref[...]                                         # (TN, H) bf16
    h = jnp.dot(x, i_w_ref[...], preferred_element_type=jnp.float32)
    h = h + i_b_ref[...]                                   # (TN, I) f32
    # TODO(synk): HF BERT uses exact erf-GELU; tanh approximation used here.
    h = 0.5 * h * (1.0 + jnp.tanh(0.7978845608028654 * (h + 0.044715 * h * h * h)))
    y = jnp.dot(h.astype(o_w_ref.dtype), o_w_ref[...],
                preferred_element_type=jnp.float32) + o_b_ref[...]
    y = y + x.astype(jnp.float32)
    mu = jnp.mean(y, axis=-1, keepdims=True)
    yc = y - mu
    var = jnp.mean(yc * yc, axis=-1, keepdims=True)
    out = yc * jax.lax.rsqrt(var + eps) * g_ref[...] + b_ref[...]
    o_ref[...] = out.astype(o_ref.dtype)


def _pooler_cls_kernel(x_ref, pw_ref, pb_ref, cw_ref, cb_ref, o_ref):
    """Fused pooler (tanh(Linear)) + classifier head. HF classifier was replaced
    by Identity and re-applied as self.fc, so this is exactly pooled -> fc."""
    x = x_ref[...].astype(jnp.float32)                     # (B, H)
    pooled = jnp.tanh(jnp.dot(x, pw_ref[...],
                              preferred_element_type=jnp.float32) + pb_ref[...])
    # Dropout before fc is a no-op in eval mode.
    o_ref[...] = jnp.dot(pooled, cw_ref[...],
                         preferred_element_type=jnp.float32) + cb_ref[...]


# ------------------------------ Pallas wrappers ----------------------------- #

_PARALLEL_1D = pltpu.CompilerParams(dimension_semantics=("parallel",))
_PARALLEL_1D_VMEM = pltpu.CompilerParams(dimension_semantics=("parallel",),
                                         vmem_limit_bytes=_VMEM_LIMIT)


def pallas_layernorm_2d(x2d, g, b, eps=1e-12, out_dtype=jnp.bfloat16):
    N, H = x2d.shape
    TN = _pick_row_tile(N)
    kernel = functools.partial(_layernorm_kernel, eps=eps)
    return pl.pallas_call(
        kernel,
        out_shape=jax.ShapeDtypeStruct((N, H), out_dtype),
        grid=(N // TN,),
        in_specs=[
            pl.BlockSpec((TN, H), lambda i: (i, 0)),
            pl.BlockSpec((1, H), lambda i: (0, 0)),
            pl.BlockSpec((1, H), lambda i: (0, 0)),
        ],
        out_specs=pl.BlockSpec((TN, H), lambda i: (i, 0)),
        compiler_params=_PARALLEL_1D,
    )(x2d, g, b)


def attention_block(x, mask, qkv_w, qkv_b, ao_w, ao_b, g, b,
                    *, num_heads, eps=1e-12):
    B, S, H = x.shape
    head_dim = H // num_heads
    kernel = functools.partial(_attn_block_kernel, num_heads=num_heads,
                               head_dim=head_dim, eps=eps)
    return pl.pallas_call(
        kernel,
        out_shape=jax.ShapeDtypeStruct((B, S, H), x.dtype),
        grid=(B,),
        in_specs=[
            pl.BlockSpec((1, S, H), lambda i: (i, 0, 0)),      # x (bf16)
            pl.BlockSpec((1, 1, S), lambda i: (i, 0, 0)),      # mask (f32)
            pl.BlockSpec((H, 3 * H), lambda i: (0, 0)),        # qkv_w (bf16)
            pl.BlockSpec((1, 3 * H), lambda i: (0, 0)),        # qkv_b (f32)
            pl.BlockSpec((H, H), lambda i: (0, 0)),            # ao_w (bf16)
            pl.BlockSpec((1, H), lambda i: (0, 0)),            # ao_b (f32)
            pl.BlockSpec((1, H), lambda i: (0, 0)),            # ln gamma
            pl.BlockSpec((1, H), lambda i: (0, 0)),            # ln beta
        ],
        out_specs=pl.BlockSpec((1, S, H), lambda i: (i, 0, 0)),
        scratch_shapes=[pltpu.VMEM((S, H), jnp.float32)],      # ctx accumulator
        compiler_params=_PARALLEL_1D_VMEM,
    )(x, mask, qkv_w, qkv_b, ao_w, ao_b, g, b)


def ffn_block(x2d, i_w, i_b, o_w, o_b, g, b, eps=1e-12):
    N, H = x2d.shape
    I = i_w.shape[1]
    TN = _pick_row_tile(N)
    kernel = functools.partial(_ffn_block_kernel, eps=eps)
    return pl.pallas_call(
        kernel,
        out_shape=jax.ShapeDtypeStruct((N, H), x2d.dtype),
        grid=(N // TN,),
        in_specs=[
            pl.BlockSpec((TN, H), lambda i: (i, 0)),           # x (bf16)
            pl.BlockSpec((H, I), lambda i: (0, 0)),            # i_w (bf16)
            pl.BlockSpec((1, I), lambda i: (0, 0)),            # i_b (f32)
            pl.BlockSpec((I, H), lambda i: (0, 0)),            # o_w (bf16)
            pl.BlockSpec((1, H), lambda i: (0, 0)),            # o_b (f32)
            pl.BlockSpec((1, H), lambda i: (0, 0)),            # ln gamma
            pl.BlockSpec((1, H), lambda i: (0, 0)),            # ln beta
        ],
        out_specs=pl.BlockSpec((TN, H), lambda i: (i, 0)),
        compiler_params=_PARALLEL_1D_VMEM,
    )(x2d, i_w, i_b, o_w, o_b, g, b)


def pooler_classifier(cls_tok, pw, pb, cw, cb):
    B, H = cls_tok.shape
    L = cw.shape[1]
    return pl.pallas_call(
        _pooler_cls_kernel,
        out_shape=jax.ShapeDtypeStruct((B, L), jnp.float32),
        grid=(1,),
        in_specs=[
            pl.BlockSpec((B, H), lambda i: (0, 0)),
            pl.BlockSpec((H, H), lambda i: (0, 0)),
            pl.BlockSpec((1, H), lambda i: (0, 0)),
            pl.BlockSpec((H, L), lambda i: (0, 0)),
            pl.BlockSpec((1, L), lambda i: (0, 0)),
        ],
        out_specs=pl.BlockSpec((B, L), lambda i: (0, 0)),
    )(cls_tok, pw, pb, cw, cb)


# -------------------------- parameters & forward --------------------------- #

CFG = dict(vocab=100, hidden=32, layers=2, heads=2, inter=64,
           max_pos=64, types=2, labels=2)


def init_params(key, cfg):
    H, I = cfg["hidden"], cfg["inter"]

    def nrm(k, shape):
        return 0.02 * jax.random.normal(k, shape, jnp.float32)

    keys = iter(jax.random.split(key, 64))
    p = {
        "word_emb": nrm(next(keys), (cfg["vocab"], H)),
        "pos_emb": nrm(next(keys), (cfg["max_pos"], H)),
        "type_emb": nrm(next(keys), (cfg["types"], H)),
        "emb_ln_g": jnp.ones((H,), jnp.float32),
        "emb_ln_b": jnp.zeros((H,), jnp.float32),
        "pool_w": nrm(next(keys), (H, H)),
        "pool_b": jnp.zeros((H,), jnp.float32),
        "cls_w": nrm(next(keys), (H, cfg["labels"])),
        "cls_b": jnp.zeros((cfg["labels"],), jnp.float32),
        "layers": [],
    }
    for _ in range(cfg["layers"]):
        p["layers"].append({
            "q_w": nrm(next(keys), (H, H)), "q_b": jnp.zeros((H,), jnp.float32),
            "k_w": nrm(next(keys), (H, H)), "k_b": jnp.zeros((H,), jnp.float32),
            "v_w": nrm(next(keys), (H, H)), "v_b": jnp.zeros((H,), jnp.float32),
            "ao_w": nrm(next(keys), (H, H)), "ao_b": jnp.zeros((H,), jnp.float32),
            "aln_g": jnp.ones((H,), jnp.float32), "aln_b": jnp.zeros((H,), jnp.float32),
            "i_w": nrm(next(keys), (H, I)), "i_b": jnp.zeros((I,), jnp.float32),
            "o_w": nrm(next(keys), (I, H)), "o_b": jnp.zeros((H,), jnp.float32),
            "oln_g": jnp.ones((H,), jnp.float32), "oln_b": jnp.zeros((H,), jnp.float32),
        })
    return p


def prepare_params(params, cfg, mm_dtype=_MM_DTYPE):
    """Fuse QKV, fold the attention scale into Q, cast matmul weights to bf16."""
    H = cfg["hidden"]
    dH = H // cfg["heads"]
    scale = 1.0 / (dH ** 0.5)

    prep = {
        "word_emb": params["word_emb"],
        "pos_emb": params["pos_emb"],
        "type_emb": params["type_emb"],
        "emb_ln_g": params["emb_ln_g"].reshape(1, H),
        "emb_ln_b": params["emb_ln_b"].reshape(1, H),
        "pool_w": params["pool_w"],                       # f32 (tiny head)
        "pool_b": params["pool_b"].reshape(1, -1),
        "cls_w": params["cls_w"],
        "cls_b": params["cls_b"].reshape(1, -1),
        "layers": [],
    }
    for lyr in params["layers"]:
        qkv_w = jnp.concatenate(
            [lyr["q_w"] * scale, lyr["k_w"], lyr["v_w"]], axis=1)      # (H, 3H)
        qkv_b = jnp.concatenate(
            [lyr["q_b"] * scale, lyr["k_b"], lyr["v_b"]]).reshape(1, -1)
        prep["layers"].append({
            "qkv_w": qkv_w.astype(mm_dtype),
            "qkv_b": qkv_b,
            "ao_w": lyr["ao_w"].astype(mm_dtype),
            "ao_b": lyr["ao_b"].reshape(1, -1),
            "aln_g": lyr["aln_g"].reshape(1, -1),
            "aln_b": lyr["aln_b"].reshape(1, -1),
            "i_w": lyr["i_w"].astype(mm_dtype),
            "i_b": lyr["i_b"].reshape(1, -1),
            "o_w": lyr["o_w"].astype(mm_dtype),
            "o_b": lyr["o_b"].reshape(1, -1),
            "oln_g": lyr["oln_g"].reshape(1, -1),
            "oln_b": lyr["oln_b"].reshape(1, -1),
        })
    return prep


def bert_forward(prep, input_ids, attention_mask, cfg):
    B, S = input_ids.shape
    H = cfg["hidden"]
    nH = cfg["heads"]

    # --- embeddings: gathers + add are JAX glue; cast to bf16 (halves the DMA
    #     traffic of the memory-bound LN kernel), LN runs in Pallas on (B*S, H).
    # TODO(synk): token_type_ids hard-coded to all-zeros (HF default when omitted).
    emb = (prep["word_emb"][input_ids]
           + prep["pos_emb"][jnp.arange(S)][None, :, :]
           + prep["type_emb"][0][None, None, :]).astype(_MM_DTYPE)   # (B, S, H)
    x2d = pallas_layernorm_2d(emb.reshape(B * S, H),
                              prep["emb_ln_g"], prep["emb_ln_b"])    # (B*S, H) bf16
    x = x2d.reshape(B, S, H)

    # (B, 1, S) mask; the bias row is computed inside the attention kernel
    # (never broadcast to (B*nH, S, S) in HBM).
    mask = attention_mask.astype(jnp.float32).reshape(B, 1, S)

    # --- encoder: 2 fused Pallas calls per layer ---
    for lyr in prep["layers"]:
        x = attention_block(x, mask, lyr["qkv_w"], lyr["qkv_b"],
                            lyr["ao_w"], lyr["ao_b"],
                            lyr["aln_g"], lyr["aln_b"], num_heads=nH)
        x = ffn_block(x.reshape(B * S, H), lyr["i_w"], lyr["i_b"],
                      lyr["o_w"], lyr["o_b"],
                      lyr["oln_g"], lyr["oln_b"]).reshape(B, S, H)

    # --- pooler (tanh Linear on [CLS]) + classifier, fused in one tiny kernel ---
    cls_tok = x[:, 0, :]                                          # (B, H) bf16
    logits = pooler_classifier(cls_tok, prep["pool_w"], prep["pool_b"],
                               prep["cls_w"], prep["cls_b"])
    return logits


if __name__ == "__main__":
    cfg = CFG
    key = jax.random.PRNGKey(0)
    pkey, ikey = jax.random.split(key)
    params = init_params(pkey, cfg)
    prep = prepare_params(params, cfg)

    B, S = 2, 8
    input_ids = jax.random.randint(ikey, (B, S), 0, cfg["vocab"], dtype=jnp.int32)
    attention_mask = jnp.ones((B, S), dtype=jnp.int32)

    fwd = jax.jit(functools.partial(bert_forward, cfg=cfg))
    logits = fwd(prep, input_ids, attention_mask)
    jax.block_until_ready(logits)
    assert logits.shape == (B, cfg["labels"])
    print("KERNEL_OK")
</pallas_src>

<mosaic_0001>
module attributes {stable_mosaic.version = 11 : i64} {
  func.func @_layernorm_kernel(%arg0: i32, %arg1: memref<8x32xbf16, #tpu.memory_space<vmem>>, %arg2: memref<1x32xf32, #tpu.memory_space<vmem>>, %arg3: memref<1x32xf32, #tpu.memory_space<vmem>>, %arg4: memref<8x32xbf16, #tpu.memory_space<vmem>>) attributes {dimension_semantics = [#tpu.dimension_semantics<parallel>], iteration_bounds = array<i64: 2>, scalar_prefetch = 0 : i64, scratch_operands = 0 : i64, tpu.core_type = #tpu.core_type<tc>, window_params = [{transform_indices = @transform_0, window_bounds = array<i64: 8, 32>}, {pipeline_mode = #tpu.pipeline_mode<synchronous>, transform_indices = @transform_1, window_bounds = array<i64: 1, 32>}, {pipeline_mode = #tpu.pipeline_mode<synchronous>, transform_indices = @transform_2, window_bounds = array<i64: 1, 32>}, {transform_indices = @transform_3, window_bounds = array<i64: 8, 32>}]} {
    %c0 = arith.constant 0 : index
    %c0_0 = arith.constant 0 : index
    %0 = vector.load %arg1[%c0, %c0_0] : memref<8x32xbf16, #tpu.memory_space<vmem>>, vector<8x32xbf16>
    %1 = arith.extf %0 : vector<8x32xbf16> to vector<8x32xf32>
    %cst = arith.constant dense<0.000000e+00> : vector<8xf32>
    %2 = vector.multi_reduction <add>, %1, %cst [1] : vector<8x32xf32> to vector<8xf32>
    %3 = vector.shape_cast %2 : vector<8xf32> to vector<8x1xf32>
    %cst_1 = arith.constant 3.200000e+01 : f32
    %4 = vector.broadcast %cst_1 : f32 to vector<8x1xf32>
    %5 = arith.divf %3, %4 : vector<8x1xf32>
    %6 = vector.broadcast %5 : vector<8x1xf32> to vector<8x32xf32>
    %7 = arith.subf %1, %6 : vector<8x32xf32>
    %8 = arith.mulf %7, %7 : vector<8x32xf32>
    %cst_2 = arith.constant dense<0.000000e+00> : vector<8xf32>
    %9 = vector.multi_reduction <add>, %8, %cst_2 [1] : vector<8x32xf32> to vector<8xf32>
    %10 = vector.shape_cast %9 : vector<8xf32> to vector<8x1xf32>
    %cst_3 = arith.constant 3.200000e+01 : f32
    %11 = vector.broadcast %cst_3 : f32 to vector<8x1xf32>
    %12 = arith.divf %10, %11 : vector<8x1xf32>
    %cst_4 = arith.constant 9.99999996E-13 : f32
    %13 = vector.broadcast %cst_4 : f32 to vector<8x1xf32>
    %14 = arith.addf %12, %13 : vector<8x1xf32>
    %15 = math.rsqrt %14 : vector<8x1xf32>
    %16 = vector.broadcast %15 : vector<8x1xf32> to vector<8x32xf32>
    %17 = arith.mulf %7, %16 : vector<8x32xf32>
    %c0_5 = arith.constant 0 : index
    %c0_6 = arith.constant 0 : index
    %18 = vector.load %arg2[%c0_5, %c0_6] : memref<1x32xf32, #tpu.memory_space<vmem>>, vector<1x32xf32>
    %19 = vector.broadcast %18 : vector<1x32xf32> to vector<8x32xf32>
    %20 = arith.mulf %17, %19 : vector<8x32xf32>
    %c0_7 = arith.constant 0 : index
    %c0_8 = arith.constant 0 : index
    %21 = vector.load %arg3[%c0_7, %c0_8] : memref<1x32xf32, #tpu.memory_space<vmem>>, vector<1x32xf32>
    %22 = vector.broadcast %21 : vector<1x32xf32> to vector<8x32xf32>
    %23 = arith.addf %20, %22 : vector<8x32xf32>
    %24 = arith.truncf %23 : vector<8x32xf32> to vector<8x32xbf16>
    %c0_9 = arith.constant 0 : index
    %c0_10 = arith.constant 0 : index
    %25 = vector.load %arg4[%c0_9, %c0_10] : memref<8x32xbf16, #tpu.memory_space<vmem>>, vector<8x32xbf16>
    tpu.vector_store %arg4[%c0_9, %c0_10], %24 {strides = array<i32>} : memref<8x32xbf16, #tpu.memory_space<vmem>>, vector<8x32xbf16>,
    return
  }
  func.func @transform_0(%arg0: i32) -> (i32, i32) {
    %c0_i32 = arith.constant 0 : i32
    %c0_i32_0 = arith.constant 0 : i32
    return %arg0, %c0_i32 : i32, i32
  }
  func.func @transform_1(%arg0: i32) -> (i32, i32) {
    %c0_i32 = arith.constant 0 : i32
    %c0_i32_0 = arith.constant 0 : i32
    %c0_i32_1 = arith.constant 0 : i32
    return %c0_i32, %c0_i32_0 : i32, i32
  }
  func.func @transform_2(%arg0: i32) -> (i32, i32) {
    %c0_i32 = arith.constant 0 : i32
    %c0_i32_0 = arith.constant 0 : i32
    %c0_i32_1 = arith.constant 0 : i32
    return %c0_i32, %c0_i32_0 : i32, i32
  }
  func.func @transform_3(%arg0: i32) -> (i32, i32) {
    %c0_i32 = arith.constant 0 : i32
    %c0_i32_0 = arith.constant 0 : i32
    return %arg0, %c0_i32 : i32, i32
  }
}

module attributes {stable_mosaic.version = 11 : i64} {
  func.func @_ffn_block_kernel(%arg0: i32, %arg1: memref<8x32xbf16, #tpu.memory_space<vmem>>, %arg2: memref<32x64xbf16, #tpu.memory_space<vmem>>, %arg3: memref<1x64xf32, #tpu.memory_space<vmem>>, %arg4: memref<64x32xbf16, #tpu.memory_space<vmem>>, %arg5: memref<1x32xf32, #tpu.memory_space<vmem>>, %arg6: memref<1x32xf32, #tpu.memory_space<vmem>>, %arg7: memref<1x32xf32, #tpu.memory_space<vmem>>, %arg8: memref<8x32xbf16, #tpu.memory_space<vmem>>) attributes {dimension_semantics = [#tpu.dimension_semantics<parallel>], iteration_bounds = array<i64: 2>, scalar_prefetch = 0 : i64, scratch_operands = 0 : i64, tpu.core_type = #tpu.core_type<tc>, window_params = [{transform_indices = @transform_0, window_bounds = array<i64: 8, 32>}, {pipeline_mode = #tpu.pipeline_mode<synchronous>, transform_indices = @transform_1, window_bounds = array<i64: 32, 64>}, {pipeline_mode = #tpu.pipeline_mode<synchronous>, transform_indices = @transform_2, window_bounds = array<i64: 1, 64>}, {pipeline_mode = #tpu.pipeline_mode<synchronous>, transform_indices = @transform_3, window_bounds = array<i64: 64, 32>}, {pipeline_mode = #tpu.pipeline_mode<synchronous>, transform_indices = @transform_4, window_bounds = array<i64: 1, 32>}, {pipeline_mode = #tpu.pipeline_mode<synchronous>, transform_indices = @transform_5, window_bounds = array<i64: 1, 32>}, {pipeline_mode = #tpu.pipeline_mode<synchronous>, transform_indices = @transform_6, window_bounds = array<i64: 1, 32>}, {transform_indices = @transform_7, window_bounds = array<i64: 8, 32>}]} {
    %c0 = arith.constant 0 : index
    %c0_0 = arith.constant 0 : index
    %0 = vector.load %arg1[%c0, %c0_0] : memref<8x32xbf16, #tpu.memory_space<vmem>>, vector<8x32xbf16>
    %c0_1 = arith.constant 0 : index
    %c0_2 = arith.constant 0 : index
    %1 = vector.load %arg2[%c0_1, %c0_2] : memref<32x64xbf16, #tpu.memory_space<vmem>>, vector<32x64xbf16>
    %cst = arith.constant dense<0.000000e+00> : vector<8x64xf32>
    %2 = tpu.matmul %0, %1, %cst {dimension_numbers = #tpu.dot_dimension_numbers<[1], [0], [0], [1], [0, 0, 1, 1], [], []>} : vector<8x32xbf16>, vector<32x64xbf16>, vector<8x64xf32> -> vector<8x64xf32>
    %c0_3 = arith.constant 0 : index
    %c0_4 = arith.constant 0 : index
    %3 = vector.load %arg3[%c0_3, %c0_4] : memref<1x64xf32, #tpu.memory_space<vmem>>, vector<1x64xf32>
    %4 = vector.broadcast %3 : vector<1x64xf32> to vector<8x64xf32>
    %5 = arith.addf %2, %4 : vector<8x64xf32>
    %cst_5 = arith.constant 5.000000e-01 : f32
    %6 = vector.broadcast %cst_5 : f32 to vector<8x64xf32>
    %7 = arith.mulf %6, %5 : vector<8x64xf32>
    %cst_6 = arith.constant 4.471500e-02 : f32
    %8 = vector.broadcast %cst_6 : f32 to vector<8x64xf32>
    %9 = arith.mulf %8, %5 : vector<8x64xf32>
    %10 = arith.mulf %9, %5 : vector<8x64xf32>
    %11 = arith.mulf %10, %5 : vector<8x64xf32>
    %12 = arith.addf %5, %11 : vector<8x64xf32>
    %cst_7 = arith.constant 0.797884583 : f32
    %13 = vector.broadcast %cst_7 : f32 to vector<8x64xf32>
    %14 = arith.mulf %13, %12 : vector<8x64xf32>
    %15 = math.tanh %14 : vector<8x64xf32>
    %cst_8 = arith.constant 1.000000e+00 : f32
    %16 = vector.broadcast %cst_8 : f32 to vector<8x64xf32>
    %17 = arith.addf %16, %15 : vector<8x64xf32>
    %18 = arith.mulf %7, %17 : vector<8x64xf32>
    %19 = arith.truncf %18 : vector<8x64xf32> to vector<8x64xbf16>
    %c0_9 = arith.constant 0 : index
    %c0_10 = arith.constant 0 : index
    %20 = vector.load %arg4[%c0_9, %c0_10] : memref<64x32xbf16, #tpu.memory_space<vmem>>, vector<64x32xbf16>
    %cst_11 = arith.constant dense<0.000000e+00> : vector<8x32xf32>
    %21 = tpu.matmul %19, %20, %cst_11 {dimension_numbers = #tpu.dot_dimension_numbers<[1], [0], [0], [1], [0, 0, 1, 1], [], []>} : vector<8x64xbf16>, vector<64x32xbf16>, vector<8x32xf32> -> vector<8x32xf32>
    %c0_12 = arith.constant 0 : index
    %c0_13 = arith.constant 0 : index
    %22 = vector.load %arg5[%c0_12, %c0_13] : memref<1x32xf32, #tpu.memory_space<vmem>>, vector<1x32xf32>
    %23 = vector.broadcast %22 : vector<1x32xf32> to vector<8x32xf32>
    %24 = arith.addf %21, %23 : vector<8x32xf32>
    %25 = arith.extf %0 : vector<8x32xbf16> to vector<8x32xf32>
    %26 = arith.addf %24, %25 : vector<8x32xf32>
    %cst_14 = arith.constant dense<0.000000e+00> : vector<8xf32>
    %27 = vector.multi_reduction <add>, %26, %cst_14 [1] : vector<8x32xf32> to vector<8xf32>
    %28 = vector.shape_cast %27 : vector<8xf32> to vector<8x1xf32>
    %cst_15 = arith.constant 3.200000e+01 : f32
    %29 = vector.broadcast %cst_15 : f32 to vector<8x1xf32>
    %30 = arith.divf %28, %29 : vector<8x1xf32>
    %31 = vector.broadcast %30 : vector<8x1xf32> to vector<8x32xf32>
    %32 = arith.subf %26, %31 : vector<8x32xf32>
    %33 = arith.mulf %32, %32 : vector<8x32xf32>
    %cst_16 = arith.constant dense<0.000000e+00> : vector<8xf32>
    %34 = vector.multi_reduction <add>, %33, %cst_16 [1] : vector<8x32xf32> to vector<8xf32>
    %35 = vector.shape_cast %34 : vector<8xf32> to vector<8x1xf32>
    %cst_17 = arith.constant 3.200000e+01 : f32
    %36 = vector.broadcast %cst_17 : f32 to vector<8x1xf32>
    %37 = arith.divf %35, %36 : vector<8x1xf32>
    %cst_18 = arith.constant 9.99999996E-13 : f32
    %38 = vector.broadcast %cst_18 : f32 to vector<8x1xf32>
    %39 = arith.addf %37, %38 : vector<8x1xf32>
    %40 = math.rsqrt %39 : vector<8x1xf32>
    %41 = vector.broadcast %40 : vector<8x1xf32> to vector<8x32xf32>
    %42 = arith.mulf %32, %41 : vector<8x32xf32>
    %c0_19 = arith.constant 0 : index
    %c0_20 = arith.constant 0 : index
    %43 = vector.load %arg6[%c0_19, %c0_20] : memref<1x32xf32, #tpu.memory_space<vmem>>, vector<1x32xf32>
    %44 = vector.broadcast %43 : vector<1x32xf32> to vector<8x32xf32>
    %45 = arith.mulf %42, %44 : vector<8x32xf32>
    %c0_21 = arith.constant 0 : index
    %c0_22 = arith.constant 0 : index
    %46 = vector.load %arg7[%c0_21, %c0_22] : memref<1x32xf32, #tpu.memory_space<vmem>>, vector<1x32xf32>
    %47 = vector.broadcast %46 : vector<1x32xf32> to vector<8x32xf32>
    %48 = arith.addf %45, %47 : vector<8x32xf32>
    %49 = arith.truncf %48 : vector<8x32xf32> to vector<8x32xbf16>
    %c0_23 = arith.constant 0 : index
    %c0_24 = arith.constant 0 : index
    %50 = vector.load %arg8[%c0_23, %c0_24] : memref<8x32xbf16, #tpu.memory_space<vmem>>, vector<8x32xbf16>
    tpu.vector_store %arg8[%c0_23, %c0_24], %49 {strides = array<i32>} : memref<8x32xbf16, #tpu.memory_space<vmem>>, vector<8x32xbf16>,
    return
  }
  func.func @transform_0(%arg0: i32) -> (i32, i32) {
    %c0_i32 = arith.constant 0 : i32
    %c0_i32_0 = arith.constant 0 : i32
    return %arg0, %c0_i32 : i32, i32
  }
  func.func @transform_1(%arg0: i32) -> (i32, i32) {
    %c0_i32 = arith.constant 0 : i32
    %c0_i32_0 = arith.constant 0 : i32
    %c0_i32_1 = arith.constant 0 : i32
    return %c0_i32, %c0_i32_0 : i32, i32
  }
  func.func @transform_2(%arg0: i32) -> (i32, i32) {
    %c0_i32 = arith.constant 0 : i32
    %c0_i32_0 = arith.constant 0 : i32
    %c0_i32_1 = arith.constant 0 : i32
    return %c0_i32, %c0_i32_0 : i32, i32
  }
  func.func @transform_3(%arg0: i32) -> (i32, i32) {
    %c0_i32 = arith.constant 0 : i32
    %c0_i32_0 = arith.constant 0 : i32
    %c0_i32_1 = arith.constant 0 : i32
    return %c0_i32, %c0_i32_0 : i32, i32
  }
  func.func @transform_4(%arg0: i32) -> (i32, i32) {
    %c0_i32 = arith.constant 0 : i32
    %c0_i32_0 = arith.constant 0 : i32
    %c0_i32_1 = arith.constant 0 : i32
    return %c0_i32, %c0_i32_0 : i32, i32
  }
  func.func @transform_5(%arg0: i32) -> (i32, i32) {
    %c0_i32 = arith.constant 0 : i32
    %c0_i32_0 = arith.constant 0 : i32
    %c0_i32_1 = arith.constant 0 : i32
    return %c0_i32, %c0_i32_0 : i32, i32
  }
  func.func @transform_6(%arg0: i32) -> (i32, i32) {
    %c0_i32 = arith.constant 0 : i32
    %c0_i32_0 = arith.constant 0 : i32
    %c0_i32_1 = arith.constant 0 : i32
    return %c0_i32, %c0_i32_0 : i32, i32
  }
  func.func @transform_7(%arg0: i32) -> (i32, i32) {
    %c0_i32 = arith.constant 0 : i32
    %c0_i32_0 = arith.constant 0 : i32
    return %arg0, %c0_i32 : i32, i32
  }
}

module attributes {stable_mosaic.version = 11 : i64} {
  func.func @_pooler_cls_kernel(%arg0: i32, %arg1: memref<2x32xbf16, #tpu.memory_space<vmem>>, %arg2: memref<32x32xf32, #tpu.memory_space<vmem>>, %arg3: memref<1x32xf32, #tpu.memory_space<vmem>>, %arg4: memref<32x2xf32, #tpu.memory_space<vmem>>, %arg5: memref<1x2xf32, #tpu.memory_space<vmem>>, %arg6: memref<2x2xf32, #tpu.memory_space<vmem>>) attributes {dimension_semantics = [#tpu.dimension_semantics<arbitrary>], iteration_bounds = array<i64: 1>, scalar_prefetch = 0 : i64, scratch_operands = 0 : i64, tpu.core_type = #tpu.core_type<tc>, window_params = [{pipeline_mode = #tpu.pipeline_mode<synchronous>, transform_indices = @transform_0, window_bounds = array<i64: 2, 32>}, {pipeline_mode = #tpu.pipeline_mode<synchronous>, transform_indices = @transform_1, window_bounds = array<i64: 32, 32>}, {pipeline_mode = #tpu.pipeline_mode<synchronous>, transform_indices = @transform_2, window_bounds = array<i64: 1, 32>}, {pipeline_mode = #tpu.pipeline_mode<synchronous>, transform_indices = @transform_3, window_bounds = array<i64: 32, 2>}, {pipeline_mode = #tpu.pipeline_mode<synchronous>, transform_indices = @transform_4, window_bounds = array<i64: 1, 2>}, {pipeline_mode = #tpu.pipeline_mode<synchronous>, transform_indices = @transform_5, window_bounds = array<i64: 2, 2>}]} {
    %c0 = arith.constant 0 : index
    %c0_0 = arith.constant 0 : index
    %0 = vector.load %arg1[%c0, %c0_0] : memref<2x32xbf16, #tpu.memory_space<vmem>>, vector<2x32xbf16>
    %1 = arith.extf %0 : vector<2x32xbf16> to vector<2x32xf32>
    %c0_1 = arith.constant 0 : index
    %c0_2 = arith.constant 0 : index
    %2 = vector.load %arg2[%c0_1, %c0_2] : memref<32x32xf32, #tpu.memory_space<vmem>>, vector<32x32xf32>
    %cst = arith.constant dense<0.000000e+00> : vector<2x32xf32>
    %3 = tpu.matmul %1, %2, %cst {dimension_numbers = #tpu.dot_dimension_numbers<[1], [0], [0], [1], [0, 0, 1, 1], [], []>} : vector<2x32xf32>, vector<32x32xf32>, vector<2x32xf32> -> vector<2x32xf32>
    %c0_3 = arith.constant 0 : index
    %c0_4 = arith.constant 0 : index
    %4 = vector.load %arg3[%c0_3, %c0_4] : memref<1x32xf32, #tpu.memory_space<vmem>>, vector<1x32xf32>
    %5 = vector.broadcast %4 : vector<1x32xf32> to vector<2x32xf32>
    %6 = arith.addf %3, %5 : vector<2x32xf32>
    %7 = math.tanh %6 : vector<2x32xf32>
    %c0_5 = arith.constant 0 : index
    %c0_6 = arith.constant 0 : index
    %8 = vector.load %arg4[%c0_5, %c0_6] : memref<32x2xf32, #tpu.memory_space<vmem>>, vector<32x2xf32>
    %cst_7 = arith.constant dense<0.000000e+00> : vector<2x2xf32>
    %9 = tpu.matmul %7, %8, %cst_7 {dimension_numbers = #tpu.dot_dimension_numbers<[1], [0], [0], [1], [0, 0, 1, 1], [], []>} : vector<2x32xf32>, vector<32x2xf32>, vector<2x2xf32> -> vector<2x2xf32>
    %c0_8 = arith.constant 0 : index
    %c0_9 = arith.constant 0 : index
    %10 = vector.load %arg5[%c0_8, %c0_9] : memref<1x2xf32, #tpu.memory_space<vmem>>, vector<1x2xf32>
    %11 = vector.broadcast %10 : vector<1x2xf32> to vector<2x2xf32>
    %12 = arith.addf %9, %11 : vector<2x2xf32>
    %c0_10 = arith.constant 0 : index
    %c0_11 = arith.constant 0 : index
    %13 = vector.load %arg6[%c0_10, %c0_11] : memref<2x2xf32, #tpu.memory_space<vmem>>, vector<2x2xf32>
    tpu.vector_store %arg6[%c0_10, %c0_11], %12 {strides = array<i32>} : memref<2x2xf32, #tpu.memory_space<vmem>>, vector<2x2xf32>,
    return
  }
  func.func @transform_0(%arg0: i32) -> (i32, i32) {
    %c0_i32 = arith.constant 0 : i32
    %c0_i32_0 = arith.constant 0 : i32
    %c0_i32_1 = arith.constant 0 : i32
    return %c0_i32, %c0_i32_0 : i32, i32
  }
  func.func @transform_1(%arg0: i32) -> (i32, i32) {
    %c0_i32 = arith.constant 0 : i32
    %c0_i32_0 = arith.constant 0 : i32
    %c0_i32_1 = arith.constant 0 : i32
    return %c0_i32, %c0_i32_0 : i32, i32
  }
  func.func @transform_2(%arg0: i32) -> (i32, i32) {
    %c0_i32 = arith.constant 0 : i32
    %c0_i32_0 = arith.constant 0 : i32
    %c0_i32_1 = arith.constant 0 : i32
    return %c0_i32, %c0_i32_0 : i32, i32
  }
  func.func @transform_3(%arg0: i32) -> (i32, i32) {
    %c0_i32 = arith.constant 0 : i32
    %c0_i32_0 = arith.constant 0 : i32
    %c0_i32_1 = arith.constant 0 : i32
    return %c0_i32, %c0_i32_0 : i32, i32
  }
  func.func @transform_4(%arg0: i32) -> (i32, i32) {
    %c0_i32 = arith.constant 0 : i32
    %c0_i32_0 = arith.constant 0 : i32
    %c0_i32_1 = arith.constant 0 : i32
    return %c0_i32, %c0_i32_0 : i32, i32
  }
  func.func @transform_5(%arg0: i32) -> (i32, i32) {
    %c0_i32 = arith.constant 0 : i32
    %c0_i32_0 = arith.constant 0 : i32
    %c0_i32_1 = arith.constant 0 : i32
    return %c0_i32, %c0_i32_0 : i32, i32
  }
}

module attributes {stable_mosaic.version = 11 : i64} {
  func.func @_attn_block_kernel(%arg0: i32, %arg1: memref<1x8x32xbf16, #tpu.memory_space<vmem>>, %arg2: memref<1x1x8xf32, #tpu.memory_space<vmem>>, %arg3: memref<32x96xbf16, #tpu.memory_space<vmem>>, %arg4: memref<1x96xf32, #tpu.memory_space<vmem>>, %arg5: memref<32x32xbf16, #tpu.memory_space<vmem>>, %arg6: memref<1x32xf32, #tpu.memory_space<vmem>>, %arg7: memref<1x32xf32, #tpu.memory_space<vmem>>, %arg8: memref<1x32xf32, #tpu.memory_space<vmem>>, %arg9: memref<1x8x32xbf16, #tpu.memory_space<vmem>>, %arg10: memref<8x32xf32, #tpu.memory_space<vmem>>) attributes {dimension_semantics = [#tpu.dimension_semantics<parallel>], iteration_bounds = array<i64: 2>, scalar_prefetch = 0 : i64, scratch_operands = 1 : i64, tpu.core_type = #tpu.core_type<tc>, window_params = [{transform_indices = @transform_0, window_bounds = array<i64: 1, 8, 32>}, {transform_indices = @transform_1, window_bounds = array<i64: 1, 1, 8>}, {pipeline_mode = #tpu.pipeline_mode<synchronous>, transform_indices = @transform_2, window_bounds = array<i64: 32, 96>}, {pipeline_mode = #tpu.pipeline_mode<synchronous>, transform_indices = @transform_3, window_bounds = array<i64: 1, 96>}, {pipeline_mode = #tpu.pipeline_mode<synchronous>, transform_indices = @transform_4, window_bounds = array<i64: 32, 32>}, {pipeline_mode = #tpu.pipeline_mode<synchronous>, transform_indices = @transform_5, window_bounds = array<i64: 1, 32>}, {pipeline_mode = #tpu.pipeline_mode<synchronous>, transform_indices = @transform_6, window_bounds = array<i64: 1, 32>}, {pipeline_mode = #tpu.pipeline_mode<synchronous>, transform_indices = @transform_7, window_bounds = array<i64: 1, 32>}, {transform_indices = @transform_8, window_bounds = array<i64: 1, 8, 32>}]} {
    %c0 = arith.constant 0 : index
    %c0_0 = arith.constant 0 : index
    %c0_1 = arith.constant 0 : index
    %0 = vector.load %arg1[%c0, %c0_0, %c0_1] : memref<1x8x32xbf16, #tpu.memory_space<vmem>>, vector<1x8x32xbf16>
    %1 = vector.shape_cast %0 : vector<1x8x32xbf16> to vector<8x32xbf16>
    %c0_2 = arith.constant 0 : index
    %c0_3 = arith.constant 0 : index
    %2 = vector.load %arg3[%c0_2, %c0_3] : memref<32x96xbf16, #tpu.memory_space<vmem>>, vector<32x96xbf16>
    %cst = arith.constant dense<0.000000e+00> : vector<8x96xf32>
    %3 = tpu.matmul %1, %2, %cst {dimension_numbers = #tpu.dot_dimension_numbers<[1], [0], [0], [1], [0, 0, 1, 1], [], []>} : vector<8x32xbf16>, vector<32x96xbf16>, vector<8x96xf32> -> vector<8x96xf32>
    %c0_4 = arith.constant 0 : index
    %c0_5 = arith.constant 0 : index
    %4 = vector.load %arg4[%c0_4, %c0_5] : memref<1x96xf32, #tpu.memory_space<vmem>>, vector<1x96xf32>
    %5 = vector.broadcast %4 : vector<1x96xf32> to vector<8x96xf32>
    %6 = arith.addf %3, %5 : vector<8x96xf32>
    %c0_6 = arith.constant 0 : index
    %c0_7 = arith.constant 0 : index
    %c0_8 = arith.constant 0 : index
    %7 = vector.load %arg2[%c0_6, %c0_7, %c0_8] : memref<1x1x8xf32, #tpu.memory_space<vmem>>, vector<1x1x8xf32>
    %8 = vector.shape_cast %7 : vector<1x1x8xf32> to vector<1x8xf32>
    %cst_9 = arith.constant 1.000000e+00 : f32
    %9 = vector.broadcast %cst_9 : f32 to vector<1x8xf32>
    %10 = arith.subf %9, %8 : vector<1x8xf32>
    %cst_10 = arith.constant -1.000000e+04 : f32
    %11 = vector.broadcast %cst_10 : f32 to vector<1x8xf32>
    %12 = arith.mulf %10, %11 : vector<1x8xf32>
    %13 = vector.extract_strided_slice %6 {offsets = [0, 0], sizes = [8, 16], strides = [1, 1]} : vector<8x96xf32> to vector<8x16xf32>
    %14 = arith.truncf %13 : vector<8x16xf32> to vector<8x16xbf16>
    %15 = vector.extract_strided_slice %6 {offsets = [0, 32], sizes = [8, 16], strides = [1, 1]} : vector<8x96xf32> to vector<8x16xf32>
    %16 = arith.truncf %15 : vector<8x16xf32> to vector<8x16xbf16>
    %17 = vector.extract_strided_slice %6 {offsets = [0, 64], sizes = [8, 16], strides = [1, 1]} : vector<8x96xf32> to vector<8x16xf32>
    %18 = arith.truncf %17 : vector<8x16xf32> to vector<8x16xbf16>
    %cst_11 = arith.constant dense<0.000000e+00> : vector<8x8xf32>
    %19 = tpu.matmul %14, %16, %cst_11 {dimension_numbers = #tpu.dot_dimension_numbers<[1], [1], [0], [0], [0, 0, 1, 0], [], []>} : vector<8x16xbf16>, vector<8x16xbf16>, vector<8x8xf32> -> vector<8x8xf32>
    %20 = vector.broadcast %12 : vector<1x8xf32> to vector<8x8xf32>
    %21 = arith.addf %19, %20 : vector<8x8xf32>
    %cst_12 = arith.constant dense<0xFF800000> : vector<8xf32>
    %22 = vector.multi_reduction <maximumf>, %21, %cst_12 [1] : vector<8x8xf32> to vector<8xf32>
    %23 = vector.shape_cast %22 : vector<8xf32> to vector<8x1xf32>
    %24 = vector.broadcast %23 : vector<8x1xf32> to vector<8x8xf32>
    %25 = arith.subf %21, %24 : vector<8x8xf32>
    %26 = math.exp %25 : vector<8x8xf32>
    %cst_13 = arith.constant dense<0.000000e+00> : vector<8xf32>
    %27 = vector.multi_reduction <add>, %26, %cst_13 [1] : vector<8x8xf32> to vector<8xf32>
    %28 = vector.shape_cast %27 : vector<8xf32> to vector<8x1xf32>
    %29 = tpu.reciprocal %28 {approx = true} : vector<8x1xf32> -> vector<8x1xf32>
    %30 = vector.broadcast %29 : vector<8x1xf32> to vector<8x8xf32>
    %31 = arith.mulf %26, %30 : vector<8x8xf32>
    %32 = arith.truncf %31 : vector<8x8xf32> to vector<8x8xbf16>
    %cst_14 = arith.constant dense<0.000000e+00> : vector<8x16xf32>
    %33 = tpu.matmul %32, %18, %cst_14 {dimension_numbers = #tpu.dot_dimension_numbers<[1], [0], [0], [1], [0, 0, 1, 1], [], []>} : vector<8x8xbf16>, vector<8x16xbf16>, vector<8x16xf32> -> vector<8x16xf32>
    %c0_15 = arith.constant 0 : index
    %c0_16 = arith.constant 0 : index
    %34 = vector.load %arg10[%c0_15, %c0_16] : memref<8x32xf32, #tpu.memory_space<vmem>>, vector<8x16xf32>
    tpu.vector_store %arg10[%c0_15, %c0_16], %33 {strides = array<i32>} : memref<8x32xf32, #tpu.memory_space<vmem>>, vector<8x16xf32>,
    %35 = vector.extract_strided_slice %6 {offsets = [0, 16], sizes = [8, 16], strides = [1, 1]} : vector<8x96xf32> to vector<8x16xf32>
    %36 = arith.truncf %35 : vector<8x16xf32> to vector<8x16xbf16>
    %37 = vector.extract_strided_slice %6 {offsets = [0, 48], sizes = [8, 16], strides = [1, 1]} : vector<8x96xf32> to vector<8x16xf32>
    %38 = arith.truncf %37 : vector<8x16xf32> to vector<8x16xbf16>
    %39 = vector.extract_strided_slice %6 {offsets = [0, 80], sizes = [8, 16], strides = [1, 1]} : vector<8x96xf32> to vector<8x16xf32>
    %40 = arith.truncf %39 : vector<8x16xf32> to vector<8x16xbf16>
    %cst_17 = arith.constant dense<0.000000e+00> : vector<8x8xf32>
    %41 = tpu.matmul %36, %38, %cst_17 {dimension_numbers = #tpu.dot_dimension_numbers<[1], [1], [0], [0], [0, 0, 1, 0], [], []>} : vector<8x16xbf16>, vector<8x16xbf16>, vector<8x8xf32> -> vector<8x8xf32>
    %42 = vector.broadcast %12 : vector<1x8xf32> to vector<8x8xf32>
    %43 = arith.addf %41, %42 : vector<8x8xf32>
    %cst_18 = arith.constant dense<0xFF800000> : vector<8xf32>
    %44 = vector.multi_reduction <maximumf>, %43, %cst_18 [1] : vector<8x8xf32> to vector<8xf32>
    %45 = vector.shape_cast %44 : vector<8xf32> to vector<8x1xf32>
    %46 = vector.broadcast %45 : vector<8x1xf32> to vector<8x8xf32>
    %47 = arith.subf %43, %46 : vector<8x8xf32>
    %48 = math.exp %47 : vector<8x8xf32>
    %cst_19 = arith.constant dense<0.000000e+00> : vector<8xf32>
    %49 = vector.multi_reduction <add>, %48, %cst_19 [1] : vector<8x8xf32> to vector<8xf32>
    %50 = vector.shape_cast %49 : vector<8xf32> to vector<8x1xf32>
    %51 = tpu.reciprocal %50 {approx = true} : vector<8x1xf32> -> vector<8x1xf32>
    %52 = vector.broadcast %51 : vector<8x1xf32> to vector<8x8xf32>
    %53 = arith.mulf %48, %52 : vector<8x8xf32>
    %54 = arith.truncf %53 : vector<8x8xf32> to vector<8x8xbf16>
    %cst_20 = arith.constant dense<0.000000e+00> : vector<8x16xf32>
    %55 = tpu.matmul %54, %40, %cst_20 {dimension_numbers = #tpu.dot_dimension_numbers<[1], [0], [0], [1], [0, 0, 1, 1], [], []>} : vector<8x8xbf16>, vector<8x16xbf16>, vector<8x16xf32> -> vector<8x16xf32>
    %c0_21 = arith.constant 0 : index
    %c16 = arith.constant 16 : index
    %56 = vector.load %arg10[%c0_21, %c16] : memref<8x32xf32, #tpu.memory_space<vmem>>, vector<8x16xf32>
    tpu.vector_store %arg10[%c0_21, %c16], %55 {strides = array<i32>} : memref<8x32xf32, #tpu.memory_space<vmem>>, vector<8x16xf32>,
    %c0_22 = arith.constant 0 : index
    %c0_23 = arith.constant 0 : index
    %57 = vector.load %arg10[%c0_22, %c0_23] : memref<8x32xf32, #tpu.memory_space<vmem>>, vector<8x32xf32>
    %58 = arith.truncf %57 : vector<8x32xf32> to vector<8x32xbf16>
    %c0_24 = arith.constant 0 : index
    %c0_25 = arith.constant 0 : index
    %59 = vector.load %arg5[%c0_24, %c0_25] : memref<32x32xbf16, #tpu.memory_space<vmem>>, vector<32x32xbf16>
    %cst_26 = arith.constant dense<0.000000e+00> : vector<8x32xf32>
    %60 = tpu.matmul %58, %59, %cst_26 {dimension_numbers = #tpu.dot_dimension_numbers<[1], [0], [0], [1], [0, 0, 1, 1], [], []>} : vector<8x32xbf16>, vector<32x32xbf16>, vector<8x32xf32> -> vector<8x32xf32>
    %c0_27 = arith.constant 0 : index
    %c0_28 = arith.constant 0 : index
    %61 = vector.load %arg6[%c0_27, %c0_28] : memref<1x32xf32, #tpu.memory_space<vmem>>, vector<1x32xf32>
    %62 = vector.broadcast %61 : vector<1x32xf32> to vector<8x32xf32>
    %63 = arith.addf %60, %62 : vector<8x32xf32>
    %64 = arith.extf %1 : vector<8x32xbf16> to vector<8x32xf32>
    %65 = arith.addf %63, %64 : vector<8x32xf32>
    %cst_29 = arith.constant dense<0.000000e+00> : vector<8xf32>
    %66 = vector.multi_reduction <add>, %65, %cst_29 [1] : vector<8x32xf32> to vector<8xf32>
    %67 = vector.shape_cast %66 : vector<8xf32> to vector<8x1xf32>
    %cst_30 = arith.constant 3.200000e+01 : f32
    %68 = vector.broadcast %cst_30 : f32 to vector<8x1xf32>
    %69 = arith.divf %67, %68 : vector<8x1xf32>
    %70 = vector.broadcast %69 : vector<8x1xf32> to vector<8x32xf32>
    %71 = arith.subf %65, %70 : vector<8x32xf32>
    %72 = arith.mulf %71, %71 : vector<8x32xf32>
    %cst_31 = arith.constant dense<0.000000e+00> : vector<8xf32>
    %73 = vector.multi_reduction <add>, %72, %cst_31 [1] : vector<8x32xf32> to vector<8xf32>
    %74 = vector.shape_cast %73 : vector<8xf32> to vector<8x1xf32>
    %cst_32 = arith.constant 3.200000e+01 : f32
    %75 = vector.broadcast %cst_32 : f32 to vector<8x1xf32>
    %76 = arith.divf %74, %75 : vector<8x1xf32>
    %cst_33 = arith.constant 9.99999996E-13 : f32
    %77 = vector.broadcast %cst_33 : f32 to vector<8x1xf32>
    %78 = arith.addf %76, %77 : vector<8x1xf32>
    %79 = math.rsqrt %78 : vector<8x1xf32>
    %80 = vector.broadcast %79 : vector<8x1xf32> to vector<8x32xf32>
    %81 = arith.mulf %71, %80 : vector<8x32xf32>
    %c0_34 = arith.constant 0 : index
    %c0_35 = arith.constant 0 : index
    %82 = vector.load %arg7[%c0_34, %c0_35] : memref<1x32xf32, #tpu.memory_space<vmem>>, vector<1x32xf32>
    %83 = vector.broadcast %82 : vector<1x32xf32> to vector<8x32xf32>
    %84 = arith.mulf %81, %83 : vector<8x32xf32>
    %c0_36 = arith.constant 0 : index
    %c0_37 = arith.constant 0 : index
    %85 = vector.load %arg8[%c0_36, %c0_37] : memref<1x32xf32, #tpu.memory_space<vmem>>, vector<1x32xf32>
    %86 = vector.broadcast %85 : vector<1x32xf32> to vector<8x32xf32>
    %87 = arith.addf %84, %86 : vector<8x32xf32>
    %88 = arith.truncf %87 : vector<8x32xf32> to vector<8x32xbf16>
    %c0_38 = arith.constant 0 : index
    %c0_39 = arith.constant 0 : index
    %c0_40 = arith.constant 0 : index
    %89 = vector.load %arg9[%c0_38, %c0_39, %c0_40] : memref<1x8x32xbf16, #tpu.memory_space<vmem>>, vector<1x8x32xbf16>
    %90 = vector.shape_cast %89 : vector<1x8x32xbf16> to vector<8x32xbf16>
    %91 = vector.shape_cast %88 : vector<8x32xbf16> to vector<1x8x32xbf16>
    tpu.vector_store %arg9[%c0_38, %c0_39, %c0_40], %91 {strides = array<i32>} : memref<1x8x32xbf16, #tpu.memory_space<vmem>>, vector<1x8x32xbf16>,
    return
  }
  func.func @transform_0(%arg0: i32) -> (i32, i32, i32) {
    %c0_i32 = arith.constant 0 : i32
    %c0_i32_0 = arith.constant 0 : i32
    %c0_i32_1 = arith.constant 0 : i32
    return %arg0, %c0_i32, %c0_i32_0 : i32, i32, i32
  }
  func.func @transform_1(%arg0: i32) -> (i32, i32, i32) {
    %c0_i32 = arith.constant 0 : i32
    %c0_i32_0 = arith.constant 0 : i32
    %c0_i32_1 = arith.constant 0 : i32
    return %arg0, %c0_i32, %c0_i32_0 : i32, i32, i32
  }
  func.func @transform_2(%arg0: i32) -> (i32, i32) {
    %c0_i32 = arith.constant 0 : i32
    %c0_i32_0 = arith.constant 0 : i32
    %c0_i32_1 = arith.constant 0 : i32
    return %c0_i32, %c0_i32_0 : i32, i32
  }
  func.func @transform_3(%arg0: i32) -> (i32, i32) {
    %c0_i32 = arith.constant 0 : i32
    %c0_i32_0 = arith.constant 0 : i32
    %c0_i32_1 = arith.constant 0 : i32
    return %c0_i32, %c0_i32_0 : i32, i32
  }
  func.func @transform_4(%arg0: i32) -> (i32, i32) {
    %c0_i32 = arith.constant 0 : i32
    %c0_i32_0 = arith.constant 0 : i32
    %c0_i32_1 = arith.constant 0 : i32
    return %c0_i32, %c0_i32_0 : i32, i32
  }
  func.func @transform_5(%arg0: i32) -> (i32, i32) {
    %c0_i32 = arith.constant 0 : i32
    %c0_i32_0 = arith.constant 0 : i32
    %c0_i32_1 = arith.constant 0 : i32
    return %c0_i32, %c0_i32_0 : i32, i32
  }
  func.func @transform_6(%arg0: i32) -> (i32, i32) {
    %c0_i32 = arith.constant 0 : i32
    %c0_i32_0 = arith.constant 0 : i32
    %c0_i32_1 = arith.constant 0 : i32
    return %c0_i32, %c0_i32_0 : i32, i32
  }
  func.func @transform_7(%arg0: i32) -> (i32, i32) {
    %c0_i32 = arith.constant 0 : i32
    %c0_i32_0 = arith.constant 0 : i32
    %c0_i32_1 = arith.constant 0 : i32
    return %c0_i32, %c0_i32_0 : i32, i32
  }
  func.func @transform_8(%arg0: i32) -> (i32, i32, i32) {
    %c0_i32 = arith.constant 0 : i32
    %c0_i32_0 = arith.constant 0 : i32
    %c0_i32_1 = arith.constant 0 : i32
    return %arg0, %c0_i32, %c0_i32_0 : i32, i32, i32
  }
}

</mosaic_0001>

<bundles_post_ra>
// kernel: bert_forward.6
= control target key start
LH: loop header
LB: loop body
LE: loop exit
PB: predicated region body
PF: predicated region fallthrough
CT: control target
= control target key end

     0   :  { %s317_s12 = smov 0   ;;  %s349_s0 = inlined_call_operand.vmem [shape: bf16[16,32], index: 0, kind: input, shape index: {}]   ;;  %s350_s1 = inlined_call_operand.vmem [shape: f32[1,32], index: 1, kind: input, shape index: {}]   ;;  %s351_s2 = inlined_call_operand.vmem [shape: f32[1,32], index: 2, kind: input, shape index: {}]   ;;  %s352_s3 = inlined_call_operand.vmem [shape: bf16[16,32], index: 3, kind: output, shape index: {}]  }
   0x1 LB: > { %s264_s13 = sadd.s32 4294967295, %s294_s12   ;;  %p268_p0 = scmp.ge.s32.totalorder %s294_s12, 1  ;;  %s294_s12 = sphi %s317_s12, %s13_s12  }
   0x2   : > { %p136_p1 = scmp.lt.s32.totalorder %s294_s12, 3 }
   0x4   : > { %p137_p2 = pnand %p268_p0, %p136_p1 }
   0x5   : > { %p158_p3 = scmp.lt.s32.totalorder (!%p137_p2), %s264_s13, 1 }
   0x6   : > { %140 = sbr.rel (%p137_p2) target bundleno = 288 (0x120), region = 32 }
   0xb   : > { %s354_s13 = smov (!%p158_p3, %s264_s13), 1  ;;  %vm168_vm0 = vcmask 261120   ;;  %v296_v3 = vmov 32.0   ;;  %v282_v24 = vld [vmem:[%s350_s1] ss:$0 sm:$0xff]  ;;  %vm209_vm5 = vcmask 257024  }
   0xc   : > { %s269_s14 = sshll.u32 %s354_s13, 2  ;;  %284 = vrcp.f32 %v296_v3  ;;  %v283_v26 = vld [vmem:[%s351_s2] ss:$0 sm:$0xff] }
   0xd   : > { %s161_s17 = scalar_lea.vmem %s349_s0, %s269_s14  ;;  %s165_s24 = scalar_lea.vmem %s352_s3, %s269_s14 }
   0xe   : > { %v166_v0 = vld [vmem:[%s161_s17] sm:$0xf] }
   0xf   : > { %v167_v1 = vunpack.c.l.bf16 %v166_v0 }
  0x11   : > { %v169_v2 = vsel %vm168_vm0, %v167_v1, 0.0 }
  0x12   : > { %170 = vadd.xlane.f32.xlu0 %v169_v2  ;;  %v285_v4 = vpop.eup %284 }
  0x13   : > { %v173_v5 = vmul.f32 32.0, %v285_v4  ;;  %vm177_vm1 = vweird.f32 %v285_v4 }
  0x15   : > { %v174_v6 = vsub.f32 1.0, %v173_v5 }
  0x17   : > { %v175_v7 = vmul.f32 %v285_v4, %v174_v6 }
  0x19   : > { %v176_v8 = vadd.f32 %v285_v4, %v175_v7 }
  0x1b   : > { %v178_v9 = vsel %vm177_vm1, %v285_v4, %v176_v8 }
  0x85   : > { %v171_v10 = vpop.xlane.xlu0 %170 }
  0x86   : > { %v179_v11 = vmul.f32 %v178_v9, %v171_v10 }
  0x88   : > { %v180_v12 = vsub.f32 %v167_v1, %v179_v11 }
  0x8a   : > { %v181_v13 = vmul.f32 %v180_v12, %v180_v12 }
  0x8c   : > { %v182_v14 = vsel %vm168_vm0, %v181_v13, 0.0 }
  0x8d   : > { %183 = vadd.xlane.f32.xlu0 %v182_v14 }
 0x100   : > { %v184_v15 = vpop.xlane.xlu0 %183 }
 0x101   : > { %v185_v16 = vmul.f32 %v184_v15, %v178_v9 }
 0x103   : > { %v186_v17 = vadd.f32 1e-12, %v185_v16 }
 0x105   : > { %286 = vrsqrt.f32 %v186_v17  ;;  %vm193_vm3 = vweird.f32 %v186_v17 }
 0x10b   : > { %v287_v18 = vpop.eup %286 }
 0x10c   : > { %v188_v19 = vmul.f32 %v287_v18, %v186_v17  ;;  %vm194_vm2 = vweird.f32 %v287_v18 }
 0x10d   : > { %vm195_vm4 = vmor %vm193_vm3, %vm194_vm2 }
 0x10e   : > { %v189_v20 = vmul.f32 %v287_v18, %v188_v19 }
 0x110   : > { %v190_v21 = vmul.f32 0.5, %v189_v20 }
 0x112   : > { %v191_v22 = vsub.f32 1.5, %v190_v21 }
 0x114   : > { %v192_v23 = vmul.f32 %v287_v18, %v191_v22 }
 0x116   : > { %v196_v25 = vsel %vm195_vm4, %v287_v18, %v192_v23 }
 0x117   : > { %v197_v27 = vmul.f32 %v196_v25, %v180_v12 }
 0x119   : > { %v202_v28 = vmul.f32 %v282_v24, %v197_v27 }
 0x11b   : > { %v207_v29 = vadd.f32 %v283_v26, %v202_v28 }
 0x11d   : > { %v208_v30 = vpack.c.bf16 %v207_v29, %v207_v29 }
 0x11f   : > { %210 = vst.msk [vmem:[%s165_s24] sm:$0xf] %vm209_vm5, %v208_v30 }
 0x120 PF: > { %s13_s12 = sadd.s32 1, %s294_s12  }
 0x121   : > { %p10_p4 = scmp.ge.s32.totalorder %s13_s12, 4  }
 0x123   :  { %12 = sbr.rel (!%p10_p4) target bundleno = 1 (0x1), region = 62 }

// kernel: bert_forward.11
= control target key start
LH: loop header
LB: loop body
LE: loop exit
PB: predicated region body
PF: predicated region fallthrough
CT: control target
= control target key end

     0   :  { %s207_s0 = inlined_call_operand.vmem [shape: bf16[2,32], index: 0, kind: input, shape index: {}]   ;;  %s208_s1 = inlined_call_operand.vmem [shape: f32[32,32], index: 1, kind: input, shape index: {}]   ;;  %s209_s2 = inlined_call_operand.vmem [shape: f32[1,32], index: 2, kind: input, shape index: {}]   ;;  %s210_s3 = inlined_call_operand.vmem [shape: f32[32,2], index: 3, kind: input, shape index: {}]   ;;  %s211_s4 = inlined_call_operand.vmem [shape: f32[1,2], index: 4, kind: input, shape index: {}]   ;;  %s212_s5 = inlined_call_operand.hbm [shape: f32[2,2], index: 5, kind: output, shape index: {}]  }
   0x1   :  { %v26_v0 = vld [vmem:[%s208_s1 + $0x18] sm:$0xff]  ;;  %v25_v1 = vld [vmem:[%s208_s1 + $0x10] sm:$0xff]  ;;  %v21_v2 = vld [vmem:[%s207_s0] sm:$0x1] }
   0x2   :  { %47 = vmatpush.msra.mxu0 %v26_v0  ;;  %v24_v3 = vld [vmem:[%s208_s1 + $0x8] sm:$0xff] }
   0x3   :  { %10 = vsyncpa [#allocation3], 0  ;;  %v23_v4 = vld [vmem:[%s208_s1] sm:$0xff]  ;;  %v22_v5 = vunpack.c.l.bf16 %v21_v2  ;;  %vm31_vm0 = vcmask 261120   ;;  %v59_v6 = vld [vmem:[%s210_s3 + $0x18] sm:$0xff]  ;;  %s138_s13 = smov [#allocation2]  }
   0x4   :  { %48 = vmatpush.msra.mxu0 %v25_v1  ;;  %79 = vmatpush.msra.mxu1 %v59_v6  ;;  %v58_v7 = vld [vmem:[%s210_s3 + $0x10] sm:$0xff]  ;;  %v57_v8 = vld [vmem:[%s210_s3 + $0x8] sm:$0xff]  ;;  %v56_v9 = vld [vmem:[%s210_s3] sm:$0xff]  ;;  %s94_s14 = sshll.u32 %s138_s13, 4  ;;  %s96_s16 = sshll.u32 %s212_s5, 4  ;;  %vm87_vm1 = vcmask 9216   ;;  %s95_s14 = int_to_ptr.vmem [resolvable:$true] %s94_s14  ;;  %s97_s16 = int_to_ptr.hbm [resolvable:$true] %s96_s16 }
   0x5   :  { %v108_v10 = vld [vmem:[%s209_s2] ss:$0 sm:$0xff] }
   0x6   :  { %49 = vmatpush.msra.mxu0 %v24_v3  ;;  %80 = vmatpush.msra.mxu1 %v58_v7  ;;  %v109_v14 = vld [vmem:[%s211_s4] ss:$0 sm:$0xff] }
   0x8   :  { %50 = vmatpush.msra.mxu0 %v23_v4  ;;  %81 = vmatpush.msra.mxu1 %v57_v8 }
   0x9   :  { %105 = vmatmul.msk.f32.vlgmr.msra.gmra.mxu0 %vm31_vm0, %v22_v5 }
   0xa   :  { %82 = vmatpush.msra.mxu1 %v56_v9 }
  0x86   :  { %v52_v11 = vpop.f32.mrf.mxu0 }
  0x87   :  { %v53_v12 = vadd.f32 %v108_v10, %v52_v11 }
  0x89   :  { %110 = vtanh.f32 %v53_v12 }
  0x8f   :  { %v111_v13 = vpop.eup %110 }
  0x90   :  { %106 = vmatmul.msk.f32.vlgmr.msra.gmra.mxu1 %vm31_vm0, %v111_v13 }
 0x10d   :  { %v84_v15 = vpop.f32.mrf.mxu1 }
 0x10e   :  { %v85_v16 = vadd.f32 %v109_v14, %v84_v15 }
 0x110   :  { %88 = vst.msk [vmem:[#allocation2] sm:$0x3] %vm87_vm1, %v85_v16 }
 0x111   :  { %99 = dma.vmem_to_hbm [thread:$0]  %s95_s14, 32, %s97_s16, [#allocation3]  }
 0x112   :  { %136 = dma.done.wait [#allocation3], 32  }
 0x113   :  { %137 = vsyncadd [#allocation3], 4294967264 }
 0x114   :  { %104 = vsyncpa [#allocation3], 1 }

// kernel: bert_forward.8
= control target key start
LH: loop header
LB: loop body
LE: loop exit
PB: predicated region body
PF: predicated region fallthrough
CT: control target
= control target key end

     0   :  { %s582_s24 = smov 0   ;;  %s639_s0 = inlined_call_operand.vmem [shape: bf16[16,32], index: 0, kind: input, shape index: {}]   ;;  %s640_s1 = inlined_call_operand.vmem [shape: bf16[32,64], index: 1, kind: input, shape index: {}]   ;;  %s641_s2 = inlined_call_operand.vmem [shape: f32[1,64], index: 2, kind: input, shape index: {}]   ;;  %s642_s3 = inlined_call_operand.vmem [shape: bf16[64,32], index: 3, kind: input, shape index: {}]   ;;  %s643_s4 = inlined_call_operand.vmem [shape: f32[1,32], index: 4, kind: input, shape index: {}]   ;;  %s644_s5 = inlined_call_operand.vmem [shape: f32[1,32], index: 5, kind: input, shape index: {}]   ;;  %s645_s6 = inlined_call_operand.vmem [shape: f32[1,32], index: 6, kind: input, shape index: {}]   ;;  %s646_s7 = inlined_call_operand.vmem [shape: bf16[16,32], index: 7, kind: output, shape index: {}]  }
   0x1 LB: > { %s473_s25 = sadd.s32 4294967295, %s539_s24   ;;  %p477_p0 = scmp.ge.s32.totalorder %s539_s24, 1  ;;  %s539_s24 = sphi %s582_s24, %s17_s24  }
   0x2   : > { %p236_p1 = scmp.lt.s32.totalorder %s539_s24, 3 }
   0x4   : > { %p237_p2 = pnand %p477_p0, %p236_p1 }
   0x5   : > { %p266_p3 = scmp.lt.s32.totalorder (!%p237_p2), %s473_s25, 1 }
   0x6   : > { %240 = sbr.rel (%p237_p2) target bundleno = 571 (0x23b), region = 48 }
   0xb   : > { %v509_v0 = vld [vmem:[%s640_s1 + $0x8] sm:$0xff]  ;;  %v508_v1 = vld [vmem:[%s640_s1] sm:$0xff]  ;;  %s648_s25 = smov (!%p266_p3, %s473_s25), 1  ;;  %vm296_vm0 = vcmask 261120   ;;  %v513_v3 = vld [vmem:[%s642_s3 + $0x18] sm:$0xff]  ;;  %vm359_vm1 = vcmask 523264  }
   0xc   : > { %306 = vmatpush.bf16.msra.mxu0 %v509_v0  ;;  %s478_s30 = sshll.u32 %s648_s25, 2  ;;  %367 = vmatpush.bf16.msra.mxu1 %v513_v3  ;;  %v512_v4 = vld [vmem:[%s642_s3 + $0x10] sm:$0xff]  ;;  %v511_v5 = vld [vmem:[%s642_s3 + $0x8] sm:$0xff]  ;;  %v510_v6 = vld [vmem:[%s642_s3] sm:$0xff]  ;;  %v541_v28 = vmov 32.0   ;;  %vm418_vm6 = vcmask 257024  }
   0xd   : > { %s269_s10 = scalar_lea.vmem %s639_s0, %s478_s30  ;;  %v523_v7 = vld [vmem:[%s641_s2] ss:$0 sm:$0xff]  ;;  %s273_s9 = scalar_lea.vmem %s646_s7, %s478_s30 }
   0xe   : > { %v275_v2 = vld [vmem:[%s269_s10] sm:$0xf] }
   0xf   : > { %v524_v21 = vld [vmem:[%s643_s4] ss:$0 sm:$0xff]  ;;  %v376_v22 = vunpack.c.l.bf16 %v275_v2 }
  0x10   : > { %307 = vmatpush.bf16.msra.mxu0 %v508_v1  ;;  %368 = vmatpush.bf16.msra.mxu1 %v512_v4  ;;  %v525_v49 = vld [vmem:[%s644_s5] ss:$0 sm:$0xff] }
  0x11   : > { %v526_v51 = vld [vmem:[%s645_s6] ss:$0 sm:$0xff] }
  0x13   : > { %488 = vmatmul.msk.bf16.vlgmr.msra.gmra.mxu0 %vm296_vm0, %v275_v2 }
  0x14   : > { %369 = vmatpush.bf16.msra.mxu1 %v511_v5 }
  0x18   : > { %370 = vmatpush.bf16.msra.mxu1 %v510_v6 }
  0x90   : > { %v309_v8 = vpop.f32.mrf.mxu0 }
  0x91   : > { %v310_v9 = vadd.f32 %v523_v7, %v309_v8 }
  0x93   : > { %v314_v10 = vmul.f32 0.044715, %v310_v9  ;;  %v313_v17 = vmul.f32 0.5, %v310_v9 }
  0x95   : > { %v315_v11 = vmul.f32 %v314_v10, %v310_v9 }
  0x97   : > { %v316_v12 = vmul.f32 %v315_v11, %v310_v9 }
  0x98   : > { %v311_v13 = vpop.f32.mrf.mxu0 }
  0x99   : > { %v317_v14 = vadd.f32 %v316_v12, %v310_v9 }
  0x9b   : > { %v318_v15 = vmul.f32 0.7978846, %v317_v14 }
  0x9d   : > { %527 = vtanh.f32 %v318_v15 }
  0x9e   : > { %529 = vrcp.f32 %v541_v28 }
  0xa3   : > { %v528_v16 = vpop.eup %527 }
  0xa4   : > { %v320_v18 = vadd.f32 1.0, %v528_v16  ;;  %v530_v29 = vpop.eup %529 }
  0xa5   : > { %v382_v30 = vmul.f32 32.0, %v530_v29  ;;  %vm386_vm2 = vweird.f32 %v530_v29 }
  0xa6   : > { %v321_v19 = vmul.f32 %v320_v18, %v313_v17 }
  0xa7   : > { %v383_v31 = vsub.f32 1.0, %v382_v30 }
  0xa8   : > { %v322_v20 = vpack.c.bf16 %v321_v19, %v321_v19 }
  0xa9   : > { %v384_v32 = vmul.f32 %v530_v29, %v383_v31 }
  0xaa   : > { %505 = vmatmul.msk.bf16.vlgmr.msra.gmra.mxu1 %vm359_vm1, %v322_v20 }
  0xab   : > { %v385_v33 = vadd.f32 %v530_v29, %v384_v32 }
  0xad   : > { %v387_v34 = vsel %vm386_vm2, %v530_v29, %v385_v33 }
 0x127   : > { %v372_v23 = vpop.f32.mrf.mxu1 }
 0x128   : > { %v373_v24 = vadd.f32 %v524_v21, %v372_v23 }
 0x12a   : > { %v377_v25 = vadd.f32 %v376_v22, %v373_v24 }
 0x12c   : > { %v378_v26 = vsel %vm296_vm0, %v377_v25, 0.0 }
 0x12d   : > { %379 = vadd.xlane.f32.xlu0 %v378_v26 }
 0x12f   : > { %v374_v27 = vpop.f32.mrf.mxu1 }
 0x1a0   : > { %v380_v35 = vpop.xlane.xlu0 %379 }
 0x1a1   : > { %v388_v36 = vmul.f32 %v387_v34, %v380_v35 }
 0x1a3   : > { %v389_v37 = vsub.f32 %v377_v25, %v388_v36 }
 0x1a5   : > { %v390_v38 = vmul.f32 %v389_v37, %v389_v37 }
 0x1a7   : > { %v391_v39 = vsel %vm296_vm0, %v390_v38, 0.0 }
 0x1a8   : > { %392 = vadd.xlane.f32.xlu0 %v391_v39 }
 0x21b   : > { %v393_v40 = vpop.xlane.xlu0 %392 }
 0x21c   : > { %v394_v41 = vmul.f32 %v393_v40, %v387_v34 }
 0x21e   : > { %v395_v42 = vadd.f32 1e-12, %v394_v41 }
 0x220   : > { %531 = vrsqrt.f32 %v395_v42  ;;  %vm402_vm4 = vweird.f32 %v395_v42 }
 0x226   : > { %v532_v43 = vpop.eup %531 }
 0x227   : > { %v397_v44 = vmul.f32 %v532_v43, %v395_v42  ;;  %vm403_vm3 = vweird.f32 %v532_v43 }
 0x228   : > { %vm404_vm5 = vmor %vm402_vm4, %vm403_vm3 }
 0x229   : > { %v398_v45 = vmul.f32 %v532_v43, %v397_v44 }
 0x22b   : > { %v399_v46 = vmul.f32 0.5, %v398_v45 }
 0x22d   : > { %v400_v47 = vsub.f32 1.5, %v399_v46 }
 0x22f   : > { %v401_v48 = vmul.f32 %v532_v43, %v400_v47 }
 0x231   : > { %v405_v50 = vsel %vm404_vm5, %v532_v43, %v401_v48 }
 0x232   : > { %v406_v52 = vmul.f32 %v405_v50, %v389_v37 }
 0x234   : > { %v411_v53 = vmul.f32 %v525_v49, %v406_v52 }
 0x236   : > { %v416_v54 = vadd.f32 %v526_v51, %v411_v53 }
 0x238   : > { %v417_v55 = vpack.c.bf16 %v416_v54, %v416_v54 }
 0x23a   : > { %419 = vst.msk [vmem:[%s273_s9] sm:$0xf] %vm418_vm6, %v417_v55 }
 0x23b PF: > { %s17_s24 = sadd.s32 1, %s539_s24  }
 0x23c   : > { %p14_p4 = scmp.ge.s32.totalorder %s17_s24, 4  }
 0x23e   :  { %16 = sbr.rel (!%p14_p4) target bundleno = 1 (0x1), region = 78 }

// kernel: bert_forward.7
= control target key start
LH: loop header
LB: loop body
LE: loop exit
PB: predicated region body
PF: predicated region fallthrough
CT: control target
= control target key end

     0   :  { %s752_s27 = smov 0   ;;  %s823_s0 = inlined_call_operand.vmem [shape: bf16[2,8,32], index: 0, kind: input, shape index: {}]   ;;  %s824_s1 = inlined_call_operand.vmem [shape: f32[2,1,8], index: 1, kind: input, shape index: {}]   ;;  %s825_s2 = inlined_call_operand.vmem [shape: bf16[32,96], index: 2, kind: input, shape index: {}]   ;;  %s826_s3 = inlined_call_operand.vmem [shape: f32[1,96], index: 3, kind: input, shape index: {}]   ;;  %s827_s4 = inlined_call_operand.vmem [shape: bf16[32,32], index: 4, kind: input, shape index: {}]   ;;  %s828_s5 = inlined_call_operand.vmem [shape: f32[1,32], index: 5, kind: input, shape index: {}]   ;;  %s829_s6 = inlined_call_operand.vmem [shape: f32[1,32], index: 6, kind: input, shape index: {}]   ;;  %s830_s7 = inlined_call_operand.vmem [shape: f32[1,32], index: 7, kind: input, shape index: {}]   ;;  %s831_s8 = inlined_call_operand.vmem [shape: bf16[2,8,32], index: 8, kind: output, shape index: {}]  }
   0x1 LB: > { %s626_s28 = sadd.s32 4294967295, %s698_s27   ;;  %p630_p0 = scmp.ge.s32.totalorder %s698_s27, 1  ;;  %s698_s27 = sphi %s752_s27, %s18_s27  }
   0x2   : > { %p269_p1 = scmp.lt.s32.totalorder %s698_s27, 3 }
   0x4   : > { %p270_p2 = pnand %p630_p0, %p269_p1 }
   0x5   : > { %p304_p3 = scmp.lt.s32.totalorder (!%p270_p2), %s626_s28, 1  ;;  %s700_s17 = smov (!%p270_p2), 112  }
   0x6   : > { %273 = sbr.rel (%p270_p2) target bundleno = 1306 (0x51a), region = 52  ;;  %s701_s18 = smov (!%p270_p2), 96  }
   0x7   : > { %s702_s19 = smov (!%p270_p2), 80   ;;  %s703_s20 = smov (!%p270_p2), 64  }
   0x8   : > { %s704_s21 = smov (!%p270_p2), 48   ;;  %s705_s29 = smov (!%p270_p2), 16  }
   0xb   : > { %v658_v0 = vld [vmem:[%s825_s2 + $0x8] sm:$0xff]  ;;  %v657_v1 = vld [vmem:[%s825_s2] sm:$0xff]  ;;  %s833_s28 = smov (!%p304_p3, %s626_s28), 1  ;;  %vm337_vm0 = vcmask 261120   ;;  %vm364_vm1 = vcmask 130048   ;;  %vm402_vm2 = vcmask 1043456  }
   0xc   : > { %347 = vmatpush.bf16.msra.mxu0 %v658_v0  ;;  %s631_s11 = sshll.u32 %s833_s28, 2  ;;  %v676_v3 = vld [vmem:[%s826_s3] ss:$0 sm:$0xff]  ;;  %s310_s24 = scalar_lea.vmem %s824_s1, %s833_s28  ;;  %vm384_vm3 = vcmask 64512   ;;  %v660_v47 = vld [vmem:[%s827_s4 + $0x8] sm:$0xff]  ;;  %vm480_vm4 = vcmask 261248  }
   0xd   : > { %s307_s14 = scalar_lea.vmem %s823_s0, %s631_s11  ;;  %v354_v17 = vld [vmem:[%s310_s24] sm:$0x1]  ;;  %v706_v63 = vmov 32.0   ;;  %vm562_vm9 = vcmask 257024  }
   0xe   : > { %v774_v2 = vld [vmem:[%s307_s14] sm:$0xf]  ;;  %v355_v18 = vsub.f32 1.0, %v354_v17 }
   0xf   : > { %v659_v52 = vld [vmem:[%s827_s4] sm:$0xff]  ;;  %v520_v57 = vunpack.c.l.bf16 %v774_v2 }
  0x10   : > { %348 = vmatpush.bf16.msra.mxu0 %v657_v1  ;;  %v356_v19 = vmul.f32 -10000.0, %v355_v18  ;;  %v677_v56 = vld [vmem:[%s828_s5] ss:$0 sm:$0xff] }
  0x12   : > { %v359_v20 = vperm.slane %v356_v19, 0 }
  0x13   : > { %641 = vmatmul.msk.bf16.vlgmr.msra.gmra.mxu0 %vm337_vm0, %v774_v2 }
  0x14   : > { %513 = vmatpush.bf16.msrb.mxu0 %v660_v47 }
  0x18   : > { %514 = vmatpush.bf16.msrb.mxu0 %v659_v52 }
  0x90   : > { %v350_v4 = vpop.f32.mrf.mxu0 }
  0x91   : > { %v351_v5 = vadd.f32 %v676_v3, %v350_v4 }
  0x93   : > { %v357_v6 = vpack.c.bf16 %v351_v5, %v351_v5 }
  0x95   : > { %420 = vrot.lane.b32.xlu1 %v357_v6, %s700_s17  ;;  %362 = vrot.lane.b32.xlu0 %v357_v6, %s701_s18 }
  0x98   : > { %v352_v7 = vpop.f32.mrf.mxu0 }
  0x9d   : > { %422 = vrot.lane.b32.xlu0 %v357_v6, %s702_s19  ;;  %s314_s19 = scalar_lea.vmem %s831_s8, %s631_s11 }
  0xa5   : > { %397 = vrot.lane.b32.xlu0 %v357_v6, %s703_s20 }
  0xad   : > { %455 = vrot.lane.b32.xlu0 %v357_v6, %s704_s21 }
 0x107   : > { %v363_v8 = vpop.permute.xlu0 %362  ;;  %v421_v12 = vpop.permute.xlu1 %420 }
 0x108   : > { %v369_v9 = vsel %vm364_vm1, %v363_v8, 0 }
 0x109   : > { %378 = vmatpush.bf16.xpose.msra.mxu1 %v369_v9 }
 0x10f   : > { %v423_v10 = vpop.permute.xlu0 %422 }
 0x110   : > { %642 = vmatmul.msk.bf16.vlgmr.msra.gmra.mxu1 %vm364_vm1, %v357_v6  ;;  %v428_v11 = vsel %vm364_vm1, %v423_v10, 0 }
 0x111   : > { %437 = vmatpush.bf16.xpose.msra.mxu3 %v428_v11 }
 0x117   : > { %v398_v13 = vpop.permute.xlu0 %397 }
 0x118   : > { %644 = vmatmul.msk.bf16.vlgmr.msra.gmra.mxu3 %vm364_vm1, %v421_v12  ;;  %v404_v14 = vsel %vm402_vm2, %v398_v13, 0 }
 0x119   : > { %413 = vmatpush.bf16.msra.mxu2 %v404_v14 }
 0x11f   : > { %v456_v15 = vpop.permute.xlu0 %455 }
 0x120   : > { %v461_v16 = vsel %vm402_vm2, %v456_v15, 0 }
 0x121   : > { %470 = vmatpush.bf16.msrb.mxu2 %v461_v16 }
 0x18d   : > { %v380_v21 = vpop.f32.mrf.mxu1 }
 0x18e   : > { %v381_v22 = vadd.f32 %v380_v21, %v359_v20 }
 0x190   : > { %v385_v23 = vsel %vm384_vm3, %v381_v22, -inf }
 0x191   : > { %386 = vmax.xlane.f32.xlu1 %v385_v23 }
 0x195   : > { %v382_v24 = vpop.f32.mrf.mxu1 }
 0x19b   : > { %v439_v25 = vpop.f32.mrf.mxu3 }
 0x19c   : > { %v440_v26 = vadd.f32 %v439_v25, %v359_v20  ;;  %v678_v20 = vld [vmem:[%s829_s6] ss:$0 sm:$0xff] }
 0x19e   : > { %v443_v27 = vsel %vm384_vm3, %v440_v26, -inf }
 0x19f   : > { %444 = vmax.xlane.f32.xlu2 %v443_v27 }
 0x1a3   : > { %v441_v28 = vpop.f32.mrf.mxu3 }
 0x204   : > { %v387_v29 = vpop.xlane.xlu1 %386 }
 0x205   : > { %v388_v30 = vsub.f32 %v381_v22, %v387_v29  ;;  %v679_v22 = vld [vmem:[%s830_s7] ss:$0 sm:$0xff] }
 0x207   : > { %v389_v31 = vmul.f32 1.442695, %v388_v30 }
 0x209   : > { %680 = vpow2.f32 %v389_v31 }
 0x20f   : > { %v681_v32 = vpop.eup %680 }
 0x210   : > { %v391_v33 = vsel %vm384_vm3, %v681_v32, 0.0 }
 0x211   : > { %392 = vadd.xlane.f32.xlu2 %v391_v33 }
 0x212   : > { %v445_v34 = vpop.xlane.xlu2 %444 }
 0x213   : > { %v446_v35 = vsub.f32 %v440_v26, %v445_v34 }
 0x215   : > { %v447_v36 = vmul.f32 1.442695, %v446_v35 }
 0x217   : > { %682 = vpow2.f32 %v447_v36 }
 0x21d   : > { %v683_v37 = vpop.eup %682 }
 0x21e   : > { %v449_v38 = vsel %vm384_vm3, %v683_v37, 0.0 }
 0x21f   : > { %450 = vadd.xlane.f32.xlu2 %v449_v38 }
 0x284   : > { %v393_v39 = vpop.xlane.xlu2 %392 }
 0x285   : > { %684 = vrcp.f32 %v393_v39 }
 0x28b   : > { %v685_v40 = vpop.eup %684 }
 0x28c   : > { %v395_v41 = vmul.f32 %v685_v40, %v681_v32 }
 0x28e   : > { %v396_v42 = vpack.c.bf16 %v395_v41, %v395_v41 }
 0x290   : > { %643 = vmatmul.msk.bf16.vlgmr.msra.gmra.mxu2 %vm384_vm3, %v396_v42 }
 0x292   : > { %v451_v43 = vpop.xlane.xlu2 %450 }
 0x293   : > { %686 = vrcp.f32 %v451_v43 }
 0x294   : > { %688 = vrcp.f32 %v706_v63 }
 0x299   : > { %v687_v44 = vpop.eup %686 }
 0x29a   : > { %v453_v45 = vmul.f32 %v687_v44, %v683_v37  ;;  %v689_v0 = vpop.eup %688 }
 0x29b   : > { %v526_v1 = vmul.f32 32.0, %v689_v0  ;;  %vm530_vm5 = vweird.f32 %v689_v0 }
 0x29c   : > { %v454_v46 = vpack.c.bf16 %v453_v45, %v453_v45 }
 0x29d   : > { %v527_v3 = vsub.f32 1.0, %v526_v1 }
 0x29f   : > { %v528_v4 = vmul.f32 %v689_v0, %v527_v3 }
 0x2a0   : > { %645 = vmatmul.msk.bf16.vlgmr.msrb.gmra.mxu2 %vm384_vm3, %v454_v46 }
 0x2a1   : > { %v529_v5 = vadd.f32 %v689_v0, %v528_v4 }
 0x2a3   : > { %v531_v6 = vsel %vm530_vm5, %v689_v0, %v529_v5 }
 0x313   : > { %v415_v48 = vpop.f32.mrf.mxu2 }
 0x314   : > { %419 = vst.msk [vmem:[#allocation2] sm:$0xff] %vm364_vm1, %v415_v48 }
 0x31b   : > { %v417_v49 = vpop.f32.mrf.mxu2 }
 0x323   : > { %v472_v50 = vpop.f32.mrf.mxu2 }
 0x324   : > { %477 = vrot.lane.b32.xlu2 %v472_v50, %s705_s29 }
 0x32b   : > { %v474_v51 = vpop.f32.mrf.mxu2 }
 0x37e   : > { %v478_v53 = vpop.permute.xlu2 %477 }
 0x37f   : > { %481 = vst.msk [vmem:[#allocation2] sm:$0xff] %vm480_vm4, %v478_v53 }
 0x386   : > { %v482_v54 = vld [vmem:[#allocation2] sm:$0xff] }
 0x387   : > { %v483_v55 = vpack.c.bf16 %v482_v54, %v482_v54 }
 0x389   : > { %654 = vmatmul.msk.bf16.vlgmr.msrb.gmra.mxu0 %vm337_vm0, %v483_v55 }
 0x406   : > { %v516_v58 = vpop.f32.mrf.mxu0 }
 0x407   : > { %v517_v59 = vadd.f32 %v677_v56, %v516_v58 }
 0x409   : > { %v521_v60 = vadd.f32 %v520_v57, %v517_v59 }
 0x40b   : > { %v522_v61 = vsel %vm337_vm0, %v521_v60, 0.0 }
 0x40c   : > { %523 = vadd.xlane.f32.xlu0 %v522_v61 }
 0x40e   : > { %v518_v62 = vpop.f32.mrf.mxu0 }
 0x47f   : > { %v524_v7 = vpop.xlane.xlu0 %523 }
 0x480   : > { %v532_v8 = vmul.f32 %v531_v6, %v524_v7 }
 0x482   : > { %v533_v9 = vsub.f32 %v521_v60, %v532_v8 }
 0x484   : > { %v534_v2 = vmul.f32 %v533_v9, %v533_v9 }
 0x486   : > { %v535_v10 = vsel %vm337_vm0, %v534_v2, 0.0 }
 0x487   : > { %536 = vadd.xlane.f32.xlu2 %v535_v10 }
 0x4fa   : > { %v537_v11 = vpop.xlane.xlu2 %536 }
 0x4fb   : > { %v538_v12 = vmul.f32 %v537_v11, %v531_v6 }
 0x4fd   : > { %v539_v13 = vadd.f32 1e-12, %v538_v12 }
 0x4ff   : > { %690 = vrsqrt.f32 %v539_v13  ;;  %vm546_vm7 = vweird.f32 %v539_v13 }
 0x505   : > { %v691_v14 = vpop.eup %690 }
 0x506   : > { %v541_v15 = vmul.f32 %v691_v14, %v539_v13  ;;  %vm547_vm6 = vweird.f32 %v691_v14 }
 0x507   : > { %vm548_vm8 = vmor %vm546_vm7, %vm547_vm6 }
 0x508   : > { %v542_v16 = vmul.f32 %v691_v14, %v541_v15 }
 0x50a   : > { %v543_v17 = vmul.f32 0.5, %v542_v16 }
 0x50c   : > { %v544_v18 = vsub.f32 1.5, %v543_v17 }
 0x50e   : > { %v545_v19 = vmul.f32 %v691_v14, %v544_v18 }
 0x510   : > { %v549_v21 = vsel %vm548_vm8, %v691_v14, %v545_v19 }
 0x511   : > { %v550_v23 = vmul.f32 %v549_v21, %v533_v9 }
 0x513   : > { %v555_v24 = vmul.f32 %v678_v20, %v550_v23 }
 0x515   : > { %v560_v25 = vadd.f32 %v679_v22, %v555_v24 }
 0x517   : > { %v561_v26 = vpack.c.bf16 %v560_v25, %v560_v25 }
 0x519   : > { %563 = vst.msk [vmem:[%s314_s19] sm:$0xf] %vm562_vm9, %v561_v26 }
 0x51a PF: > { %s18_s27 = sadd.s32 1, %s698_s27  }
 0x51b   : > { %p15_p4 = scmp.ge.s32.totalorder %s18_s27, 4  }
 0x51d   :  { %17 = sbr.rel (!%p15_p4) target bundleno = 1 (0x1), region = 85 }

</bundles_post_ra>
